<compile_context>
chip_gen: v7x
topology: tpu7x:2x2x1
jax: 0.10.0
libtpu: 0.0.40
codegen_flags: <defaults>
</compile_context>

<pallas_src>
import jax
import jax.numpy as jnp
from jax.experimental import pallas as pl
from jax.experimental.pallas import tpu as pltpu


def _round_up(x: int, m: int) -> int:
    return (x + m - 1) // m * m


def _cdiv(a: int, b: int) -> int:
    return -(-a // b)


def mlp_kernel(x_ref, w1_ref, b1_ref, w2_ref, b2_ref, o_ref):
    # x:  [TB, D_in] (native dtype)   w1: [D_in, H] bf16   b1: [1, H] f32
    # w2: [H, C_pad] bf16             b2: [1, C_pad] f32   o:  [TB, C_pad] x.dtype
    #
    # Cast x per-tile for the MXU (free VPU op, hidden under the tile DMA).
    x_bf16 = x_ref[...].astype(jnp.bfloat16)
    # First matmul: bf16 inputs, f32 accumulation on the MXU.
    h = jnp.dot(x_bf16, w1_ref[...], preferred_element_type=jnp.float32)
    # Bias + ReLU in f32 (epilogue on the VPU).
    h = jnp.maximum(h + b1_ref[...], 0.0)
    # Second matmul: feed the MXU bf16 again, accumulate in f32.
    out = jnp.dot(h.astype(w2_ref.dtype), w2_ref[...],
                  preferred_element_type=jnp.float32)
    # Final store in the output (== input) dtype.
    o_ref[...] = (out + b2_ref[...]).astype(o_ref.dtype)


def mlp_forward(x, w1, b1, w2, b2, *, block_b: int = 512):
    """relu(x @ w1 + b1) @ w2 + b2, fused in a single Pallas kernel.

    x:  [B, D_in]      w1: [D_in, H]   b1: [H]
    w2: [H, C]         b2: [C]         returns [B, C] in x.dtype
    """
    B, D_in = x.shape
    H = w1.shape[1]
    C = w2.shape[1]
    out_dtype = x.dtype

    # Lane-dense (multiple-of-128) padded class dim; zero padding keeps the
    # real logits exact, padded columns are sliced off below.
    # TODO(synk): A/B-test a masked-store true-width-C output for the
    # large-B / tiny-C regime where padded writeback dominates HBM traffic.
    C_pad = _round_up(C, 128)

    x_bytes = x.dtype.itemsize
    out_bytes = jnp.dtype(out_dtype).itemsize

    # --- VMEM budget (v7x: 64 MiB physical, 32 MiB scoped default) ---------
    weight_bytes = D_in * H * 2 + H * C_pad * 2 + (H + C_pad) * 4
    # Per batch row: double-buffered x tile + double-buffered out tile + f32 h.
    per_row_bytes = 2 * D_in * x_bytes + 2 * C_pad * out_bytes + H * 4
    budget = 48 << 20
    avail = max(budget - 2 * weight_bytes, 0)       # conservative: 2 weight bufs
    tb_cap = max(8, (avail // max(per_row_bytes, 1)) // 8 * 8)
    block_b = max(8, min(block_b, tb_cap))

    # --- Balanced batch tiling ----------------------------------------------
    n_tiles = max(1, _cdiv(B, block_b))
    if n_tiles > 1 and n_tiles % 2:
        n_tiles += 1          # v7x: even tile count keeps both TCs busy
    TB = _round_up(_cdiv(B, n_tiles), 8)
    B_pad = _round_up(B, TB)
    n_tiles = B_pad // TB

    # x stays in its native dtype; pad rows only if strictly needed.
    x_in = x if B_pad == B else jnp.pad(x, ((0, B_pad - B), (0, 0)))

    # Weights: one-time (tiny) bf16 cast; zero-pad class dim for lane density.
    w1_b = w1.astype(jnp.bfloat16)
    w2_p = jnp.pad(w2.astype(jnp.bfloat16), ((0, 0), (0, C_pad - C)))
    b1_2d = b1.astype(jnp.float32).reshape(1, H)
    b2_2d = jnp.pad(b2.astype(jnp.float32), (0, C_pad - C)).reshape(1, C_pad)

    footprint = 2 * weight_bytes + TB * per_row_bytes
    vmem_limit = int(min(max(footprint + (4 << 20), 32 << 20), 56 << 20))

    flops = 2 * B_pad * (D_in * H + H * C_pad)
    bytes_accessed = (B_pad * D_in * x_bytes          # x, native dtype
                      + weight_bytes                  # bf16 weights + f32 biases
                      + B_pad * C_pad * out_bytes)    # output in x.dtype

    def build(weight_mode):
        def const_spec(shape):
            idx = lambda i: (0,) * len(shape)
            if weight_mode is None:
                return pl.BlockSpec(shape, idx)
            return pl.BlockSpec(shape, idx, pipeline_mode=weight_mode)

        return pl.pallas_call(
            mlp_kernel,
            out_shape=jax.ShapeDtypeStruct((B_pad, C_pad), out_dtype),
            grid=(n_tiles,),
            in_specs=[
                # x streams one batch tile per grid step.
                pl.BlockSpec((TB, D_in), lambda i: (i, 0)),
                # Weights / biases: constant index_map -> VMEM-resident.
                const_spec((D_in, H)),
                const_spec((1, H)),
                const_spec((H, C_pad)),
                const_spec((1, C_pad)),
            ],
            out_specs=pl.BlockSpec((TB, C_pad), lambda i: (i, 0)),
            compiler_params=pltpu.CompilerParams(
                # Batch tiles are independent -> shard across both TCs on v7x.
                dimension_semantics=("parallel",),
                vmem_limit_bytes=vmem_limit,
            ),
            cost_estimate=pl.CostEstimate(
                flops=flops, transcendentals=0,
                bytes_accessed=bytes_accessed),
        )

    args = (x_in, w1_b, b1_2d, w2_p, b2_2d)
    try:
        # Constant-index weight/bias blocks only need a single pipeline buffer.
        out_padded = build(pl.Buffered(1))(*args)
    except Exception:
        # Fallback if this JAX build rejects the pipeline_mode hint; default
        # double buffering, correctness unaffected.
        out_padded = build(None)(*args)

    # Drop batch/class padding; padded logits never leak to the caller.
    return out_padded[:B, :C]


def init_params(key, input_size, hidden_size, num_classes):
    # Mimic PyTorch nn.Linear init (uniform +/- 1/sqrt(fan_in)), stored [in, out].
    k1, k2, k3, k4 = jax.random.split(key, 4)
    bound1 = 1.0 / jnp.sqrt(input_size)
    bound2 = 1.0 / jnp.sqrt(hidden_size)
    w1 = jax.random.uniform(k1, (input_size, hidden_size), jnp.float32,
                            -bound1, bound1)
    b1 = jax.random.uniform(k2, (hidden_size,), jnp.float32, -bound1, bound1)
    w2 = jax.random.uniform(k3, (hidden_size, num_classes), jnp.float32,
                            -bound2, bound2)
    b2 = jax.random.uniform(k4, (num_classes,), jnp.float32, -bound2, bound2)
    return w1, b1, w2, b2


if __name__ == "__main__":
    # Small shapes consistent with the MLP-on-MNIST module.
    batch = 8
    input_size = 256
    hidden_size = 128
    num_classes = 10

    key = jax.random.PRNGKey(0)
    kx, kp = jax.random.split(key)
    x = jax.random.normal(kx, (batch, input_size), dtype=jnp.float32)
    w1, b1, w2, b2 = init_params(kp, input_size, hidden_size, num_classes)

    out = mlp_forward(x, w1, b1, w2, b2)
    out = jax.block_until_ready(out)
    assert out.shape == (batch, num_classes)
    assert out.dtype == x.dtype

    # Reference 1: same bf16-input / f32-accumulate math as the kernel (tight).
    xb, w1b, w2b = (a.astype(jnp.bfloat16) for a in (x, w1, w2))
    h_ref = jnp.maximum(
        jnp.dot(xb, w1b, preferred_element_type=jnp.float32) + b1, 0.0)
    ref_bf16 = jnp.dot(h_ref.astype(jnp.bfloat16), w2b,
                       preferred_element_type=jnp.float32) + b2
    assert jnp.allclose(out, ref_bf16, atol=2e-3, rtol=2e-3)

    # Reference 2: full-f32 PyTorch-equivalent forward (loose, bf16 rounding).
    ref_f32 = jnp.maximum(x @ w1 + b1, 0.0) @ w2 + b2
    assert jnp.allclose(out, ref_f32, atol=5e-2, rtol=5e-2)

    print("KERNEL_OK")
</pallas_src>

<mosaic_0001>
module attributes {stable_mosaic.version = 11 : i64} {
  func.func @mlp_kernel(%arg0: i32, %arg1: memref<8x256xf32, #tpu.memory_space<vmem>>, %arg2: memref<256x128xbf16, #tpu.memory_space<vmem>>, %arg3: memref<1x128xf32, #tpu.memory_space<vmem>>, %arg4: memref<128x128xbf16, #tpu.memory_space<vmem>>, %arg5: memref<1x128xf32, #tpu.memory_space<vmem>>, %arg6: memref<8x128xf32, #tpu.memory_space<vmem>>) attributes {dimension_semantics = [#tpu.dimension_semantics<parallel>], iteration_bounds = array<i64: 1>, scalar_prefetch = 0 : i64, scratch_operands = 0 : i64, tpu.core_type = #tpu.core_type<tc>, window_params = [{transform_indices = @transform_0, window_bounds = array<i64: 8, 256>}, {pipeline_mode = #tpu.pipeline_mode<synchronous>, transform_indices = @transform_1, window_bounds = array<i64: 256, 128>}, {pipeline_mode = #tpu.pipeline_mode<synchronous>, transform_indices = @transform_2, window_bounds = array<i64: 1, 128>}, {pipeline_mode = #tpu.pipeline_mode<synchronous>, transform_indices = @transform_3, window_bounds = array<i64: 128, 128>}, {pipeline_mode = #tpu.pipeline_mode<synchronous>, transform_indices = @transform_4, window_bounds = array<i64: 1, 128>}, {transform_indices = @transform_5, window_bounds = array<i64: 8, 128>}]} {
    %c0 = arith.constant 0 : index
    %c0_0 = arith.constant 0 : index
    %0 = vector.load %arg1[%c0, %c0_0] : memref<8x256xf32, #tpu.memory_space<vmem>>, vector<8x256xf32>
    %1 = arith.truncf %0 : vector<8x256xf32> to vector<8x256xbf16>
    %c0_1 = arith.constant 0 : index
    %c0_2 = arith.constant 0 : index
    %2 = vector.load %arg2[%c0_1, %c0_2] : memref<256x128xbf16, #tpu.memory_space<vmem>>, vector<256x128xbf16>
    %cst = arith.constant dense<0.000000e+00> : vector<8x128xf32>
    %3 = tpu.matmul %1, %2, %cst {dimension_numbers = #tpu.dot_dimension_numbers<[1], [0], [0], [1], [0, 0, 1, 1], [], []>} : vector<8x256xbf16>, vector<256x128xbf16>, vector<8x128xf32> -> vector<8x128xf32>
    %c0_3 = arith.constant 0 : index
    %c0_4 = arith.constant 0 : index
    %4 = vector.load %arg3[%c0_3, %c0_4] : memref<1x128xf32, #tpu.memory_space<vmem>>, vector<1x128xf32>
    %5 = vector.broadcast %4 : vector<1x128xf32> to vector<8x128xf32>
    %6 = arith.addf %3, %5 : vector<8x128xf32>
    %cst_5 = arith.constant 0.000000e+00 : f32
    %7 = vector.broadcast %cst_5 : f32 to vector<8x128xf32>
    %8 = arith.maximumf %6, %7 : vector<8x128xf32>
    %9 = arith.truncf %8 : vector<8x128xf32> to vector<8x128xbf16>
    %c0_6 = arith.constant 0 : index
    %c0_7 = arith.constant 0 : index
    %10 = vector.load %arg4[%c0_6, %c0_7] : memref<128x128xbf16, #tpu.memory_space<vmem>>, vector<128x128xbf16>
    %cst_8 = arith.constant dense<0.000000e+00> : vector<8x128xf32>
    %11 = tpu.matmul %9, %10, %cst_8 {dimension_numbers = #tpu.dot_dimension_numbers<[1], [0], [0], [1], [0, 0, 1, 1], [], []>} : vector<8x128xbf16>, vector<128x128xbf16>, vector<8x128xf32> -> vector<8x128xf32>
    %c0_9 = arith.constant 0 : index
    %c0_10 = arith.constant 0 : index
    %12 = vector.load %arg5[%c0_9, %c0_10] : memref<1x128xf32, #tpu.memory_space<vmem>>, vector<1x128xf32>
    %13 = vector.broadcast %12 : vector<1x128xf32> to vector<8x128xf32>
    %14 = arith.addf %11, %13 : vector<8x128xf32>
    %c0_11 = arith.constant 0 : index
    %c0_12 = arith.constant 0 : index
    %15 = vector.load %arg6[%c0_11, %c0_12] : memref<8x128xf32, #tpu.memory_space<vmem>>, vector<8x128xf32>
    tpu.vector_store %arg6[%c0_11, %c0_12], %14 {strides = array<i32>} : memref<8x128xf32, #tpu.memory_space<vmem>>, vector<8x128xf32>,
    return
  }
  func.func @transform_0(%arg0: i32) -> (i32, i32) {
    %c0_i32 = arith.constant 0 : i32
    %c0_i32_0 = arith.constant 0 : i32
    return %arg0, %c0_i32 : i32, i32
  }
  func.func @transform_1(%arg0: i32) -> (i32, i32) {
    %c0_i32 = arith.constant 0 : i32
    %c0_i32_0 = arith.constant 0 : i32
    %c0_i32_1 = arith.constant 0 : i32
    return %c0_i32, %c0_i32_0 : i32, i32
  }
  func.func @transform_2(%arg0: i32) -> (i32, i32) {
    %c0_i32 = arith.constant 0 : i32
    %c0_i32_0 = arith.constant 0 : i32
    %c0_i32_1 = arith.constant 0 : i32
    return %c0_i32, %c0_i32_0 : i32, i32
  }
  func.func @transform_3(%arg0: i32) -> (i32, i32) {
    %c0_i32 = arith.constant 0 : i32
    %c0_i32_0 = arith.constant 0 : i32
    %c0_i32_1 = arith.constant 0 : i32
    return %c0_i32, %c0_i32_0 : i32, i32
  }
  func.func @transform_4(%arg0: i32) -> (i32, i32) {
    %c0_i32 = arith.constant 0 : i32
    %c0_i32_0 = arith.constant 0 : i32
    %c0_i32_1 = arith.constant 0 : i32
    return %c0_i32, %c0_i32_0 : i32, i32
  }
  func.func @transform_5(%arg0: i32) -> (i32, i32) {
    %c0_i32 = arith.constant 0 : i32
    %c0_i32_0 = arith.constant 0 : i32
    return %arg0, %c0_i32 : i32, i32
  }
}

module attributes {stable_mosaic.version = 11 : i64} {
  func.func @mlp_kernel(%arg0: i32, %arg1: memref<8x256xf32, #tpu.memory_space<vmem>>, %arg2: memref<256x128xbf16, #tpu.memory_space<vmem>>, %arg3: memref<1x128xf32, #tpu.memory_space<vmem>>, %arg4: memref<128x128xbf16, #tpu.memory_space<vmem>>, %arg5: memref<1x128xf32, #tpu.memory_space<vmem>>, %arg6: memref<8x128xf32, #tpu.memory_space<vmem>>) attributes {dimension_semantics = [#tpu.dimension_semantics<parallel>], iteration_bounds = array<i64: 1>, scalar_prefetch = 0 : i64, scratch_operands = 0 : i64, tpu.core_type = #tpu.core_type<tc>, window_params = [{transform_indices = @transform_0, window_bounds = array<i64: 8, 256>}, {pipeline_mode = #tpu.pipeline_mode<synchronous>, transform_indices = @transform_1, window_bounds = array<i64: 256, 128>}, {pipeline_mode = #tpu.pipeline_mode<synchronous>, transform_indices = @transform_2, window_bounds = array<i64: 1, 128>}, {pipeline_mode = #tpu.pipeline_mode<synchronous>, transform_indices = @transform_3, window_bounds = array<i64: 128, 128>}, {pipeline_mode = #tpu.pipeline_mode<synchronous>, transform_indices = @transform_4, window_bounds = array<i64: 1, 128>}, {transform_indices = @transform_5, window_bounds = array<i64: 8, 128>}]} {
    %c0 = arith.constant 0 : index
    %c0_0 = arith.constant 0 : index
    %0 = vector.load %arg1[%c0, %c0_0] : memref<8x256xf32, #tpu.memory_space<vmem>>, vector<8x256xf32>
    %1 = arith.truncf %0 : vector<8x256xf32> to vector<8x256xbf16>
    %c0_1 = arith.constant 0 : index
    %c0_2 = arith.constant 0 : index
    %2 = vector.load %arg2[%c0_1, %c0_2] : memref<256x128xbf16, #tpu.memory_space<vmem>>, vector<256x128xbf16>
    %cst = arith.constant dense<0.000000e+00> : vector<8x128xf32>
    %3 = tpu.matmul %1, %2, %cst {dimension_numbers = #tpu.dot_dimension_numbers<[1], [0], [0], [1], [0, 0, 1, 1], [], []>} : vector<8x256xbf16>, vector<256x128xbf16>, vector<8x128xf32> -> vector<8x128xf32>
    %c0_3 = arith.constant 0 : index
    %c0_4 = arith.constant 0 : index
    %4 = vector.load %arg3[%c0_3, %c0_4] : memref<1x128xf32, #tpu.memory_space<vmem>>, vector<1x128xf32>
    %5 = vector.broadcast %4 : vector<1x128xf32> to vector<8x128xf32>
    %6 = arith.addf %3, %5 : vector<8x128xf32>
    %cst_5 = arith.constant 0.000000e+00 : f32
    %7 = vector.broadcast %cst_5 : f32 to vector<8x128xf32>
    %8 = arith.maximumf %6, %7 : vector<8x128xf32>
    %9 = arith.truncf %8 : vector<8x128xf32> to vector<8x128xbf16>
    %c0_6 = arith.constant 0 : index
    %c0_7 = arith.constant 0 : index
    %10 = vector.load %arg4[%c0_6, %c0_7] : memref<128x128xbf16, #tpu.memory_space<vmem>>, vector<128x128xbf16>
    %cst_8 = arith.constant dense<0.000000e+00> : vector<8x128xf32>
    %11 = tpu.matmul %9, %10, %cst_8 {dimension_numbers = #tpu.dot_dimension_numbers<[1], [0], [0], [1], [0, 0, 1, 1], [], []>} : vector<8x128xbf16>, vector<128x128xbf16>, vector<8x128xf32> -> vector<8x128xf32>
    %c0_9 = arith.constant 0 : index
    %c0_10 = arith.constant 0 : index
    %12 = vector.load %arg5[%c0_9, %c0_10] : memref<1x128xf32, #tpu.memory_space<vmem>>, vector<1x128xf32>
    %13 = vector.broadcast %12 : vector<1x128xf32> to vector<8x128xf32>
    %14 = arith.addf %11, %13 : vector<8x128xf32>
    %c0_11 = arith.constant 0 : index
    %c0_12 = arith.constant 0 : index
    %15 = vector.load %arg6[%c0_11, %c0_12] : memref<8x128xf32, #tpu.memory_space<vmem>>, vector<8x128xf32>
    tpu.vector_store %arg6[%c0_11, %c0_12], %14 {strides = array<i32>} : memref<8x128xf32, #tpu.memory_space<vmem>>, vector<8x128xf32>,
    return
  }
  func.func @transform_0(%arg0: i32) -> (i32, i32) {
    %c0_i32 = arith.constant 0 : i32
    %c0_i32_0 = arith.constant 0 : i32
    return %arg0, %c0_i32 : i32, i32
  }
  func.func @transform_1(%arg0: i32) -> (i32, i32) {
    %c0_i32 = arith.constant 0 : i32
    %c0_i32_0 = arith.constant 0 : i32
    %c0_i32_1 = arith.constant 0 : i32
    return %c0_i32, %c0_i32_0 : i32, i32
  }
  func.func @transform_2(%arg0: i32) -> (i32, i32) {
    %c0_i32 = arith.constant 0 : i32
    %c0_i32_0 = arith.constant 0 : i32
    %c0_i32_1 = arith.constant 0 : i32
    return %c0_i32, %c0_i32_0 : i32, i32
  }
  func.func @transform_3(%arg0: i32) -> (i32, i32) {
    %c0_i32 = arith.constant 0 : i32
    %c0_i32_0 = arith.constant 0 : i32
    %c0_i32_1 = arith.constant 0 : i32
    return %c0_i32, %c0_i32_0 : i32, i32
  }
  func.func @transform_4(%arg0: i32) -> (i32, i32) {
    %c0_i32 = arith.constant 0 : i32
    %c0_i32_0 = arith.constant 0 : i32
    %c0_i32_1 = arith.constant 0 : i32
    return %c0_i32, %c0_i32_0 : i32, i32
  }
  func.func @transform_5(%arg0: i32) -> (i32, i32) {
    %c0_i32 = arith.constant 0 : i32
    %c0_i32_0 = arith.constant 0 : i32
    return %arg0, %c0_i32 : i32, i32
  }
}

</mosaic_0001>

<bundles_post_ra>
// kernel: tpu_custom_call.1
= control target key start
LH: loop header
LB: loop body
LE: loop exit
PB: predicated region body
PF: predicated region fallthrough
CT: control target
= control target key end

     0   :  { %10 = vsyncpa [#allocation3], 0  ;;  %s680_s0 = inlined_call_operand.hbm [shape: f32[8,256], index: 0, kind: input, shape index: {}]   ;;  %s681_s1 = inlined_call_operand.hbm [shape: bf16[256,128], index: 1, kind: input, shape index: {}]   ;;  %s682_s2 = inlined_call_operand.vmem [shape: f32[1,128], index: 2, kind: input, shape index: {}]   ;;  %s683_s3 = inlined_call_operand.hbm [shape: bf16[128,128], index: 3, kind: input, shape index: {}]   ;;  %s684_s4 = inlined_call_operand.vmem [shape: f32[1,128], index: 4, kind: input, shape index: {}]   ;;  %s685_s5 = inlined_call_operand.hbm [shape: f32[8,128], index: 5, kind: output, shape index: {}]  }
   0x1   :  { %11 = vsyncpa [#allocation6], 0 }
   0x2   :  { %12 = vsyncpa [#allocation4], 0  ;;  %s573_s18 = smov [#allocation5]   ;;  %s479_s22 = scalar_lea.hbm %s681_s1, 2048 }
   0x3   :  { %s28_s19 = sshll.u32 %s573_s18, 4  ;;  %p480_p0 = scmp.ne.s32.totalorder %s681_s1, %s479_s22  ;;  %s29_s19 = int_to_ptr.vmem [resolvable:$true] %s28_s19 }
   0x4   :  { %p483_p1 = scmp.lt.u32.totalorder %s479_s22, %s681_s1 }
   0x6   :  { %p485_p2 = pnand %p483_p1, %p480_p0 }
   0x8   :  { %488 = shalt.err (!%p485_p2)
}
   0x9   :  { %s489_s27 = scalar_lea.vmem %s29_s19, 2048  ;;  %p494_p4 = scmp.lt.s32.totalorder %s29_s19, %s29_s19 }
   0xa   :  { %p490_p3 = scmp.ne.s32.totalorder %s29_s19, %s489_s27  ;;  %p495_p5 = scmp.lt.s32.totalorder %s489_s27, %s489_s27 }
   0xc   :  { %p496_p6 = por %p495_p5, %p494_p4 }
   0xe   :  { %p497_p7 = pnand %p496_p6, %p490_p3 }
  0x10   :  { %500 = shalt.err (!%p497_p7)
}
  0x11   :  { %s574_s28 = smov 64   ;;  %s575_s29 = smov 4  }
  0x12   :  { %34 = dma.hbm_to_vmem [thread:$0]  %s681_s1, 2048, %s29_s19, [#allocation6], %s574_s28, %s574_s28, %s575_s29  }
  0x13   :  { %s576_s7 = smov [#allocation2]   ;;  %s577_s9 = smov [#allocation7]  }
  0x14   :  { %s19_s8 = sshll.u32 %s576_s7, 4  ;;  %s42_s10 = sshll.u32 %s577_s9, 4  ;;  %s20_s8 = int_to_ptr.vmem [resolvable:$true] %s19_s8  ;;  %s43_s10 = int_to_ptr.vmem [resolvable:$true] %s42_s10 }
  0x15   :  { %s501_s13 = scalar_lea.hbm %s680_s0, 256 }
  0x16   :  { %p502_p8 = scmp.ne.s32.totalorder %s680_s0, %s501_s13  ;;  %p505_p9 = scmp.lt.u32.totalorder %s501_s13, %s680_s0 }
  0x18   :  { %p507_p10 = pnand %p505_p9, %p502_p8 }
  0x1a   :  { %510 = shalt.err (!%p507_p10)
}
  0x1b   :  { %s511_s1 = scalar_lea.vmem %s20_s8, 256  ;;  %p516_p12 = scmp.lt.s32.totalorder %s20_s8, %s20_s8 }
  0x1c   :  { %p512_p11 = scmp.ne.s32.totalorder %s20_s8, %s511_s1  ;;  %p517_p13 = scmp.lt.s32.totalorder %s511_s1, %s511_s1 }
  0x1e   :  { %p518_p0 = por %p517_p13, %p516_p12 }
  0x20   :  { %p519_p1 = pnand %p518_p0, %p512_p11 }
  0x22   :  { %522 = shalt.err (!%p519_p1)
}
  0x23   :  { %22 = dma.hbm_to_vmem [thread:$0]  %s680_s0, 256, %s20_s8, [#allocation3]  }
  0x24   :  { %s523_s22 = scalar_lea.hbm %s683_s3, 1024 }
  0x25   :  { %p524_p2 = scmp.ne.s32.totalorder %s683_s3, %s523_s22  ;;  %p527_p3 = scmp.lt.u32.totalorder %s523_s22, %s683_s3 }
  0x27   :  { %p529_p4 = pnand %p527_p3, %p524_p2 }
  0x29   :  { %532 = shalt.err (!%p529_p4)
}
  0x2a   :  { %s533_s27 = scalar_lea.vmem %s43_s10, 1024  ;;  %p538_p6 = scmp.lt.s32.totalorder %s43_s10, %s43_s10 }
  0x2b   :  { %p534_p5 = scmp.ne.s32.totalorder %s43_s10, %s533_s27  ;;  %p539_p7 = scmp.lt.s32.totalorder %s533_s27, %s533_s27 }
  0x2d   :  { %p540_p8 = por %p539_p7, %p538_p6 }
  0x2f   :  { %p541_p9 = pnand %p540_p8, %p534_p5 }
  0x31   :  { %544 = shalt.err (!%p541_p9)
}
  0x32   :  { %48 = dma.hbm_to_vmem [thread:$0]  %s683_s3, 1024, %s43_s10, [#allocation6], %s574_s28, %s574_s28, %s575_s29  }
  0x33   :  { %567 = dma.done.wait [#allocation3], 256  }
  0x34   :  { %568 = vsyncadd [#allocation3], 4294967040 }
  0x35   :  { %569 = dma.done.wait [#allocation6], 3072  }
  0x36   :  { %570 = vsyncadd [#allocation6], 4294964224  ;;  %v578_v0 = vmov 0.0   ;;  %v455_v1 = vld [vmem:[#allocation5 + $0x40] sm:$0xff]   ;;  %v457_v3 = vld [vmem:[#allocation5 + $0x48] sm:$0xff]   ;;  %vm579_vm0 = vmmov 0  }
  0x37   :  { %427 = vmatprep.subr.bf16.mxu1 %v578_v0  ;;  %v456_v2 = vld [vmem:[#allocation5] sm:$0xff]   ;;  %396 = vmatprep.subr.bf16.mxu0 %v455_v1  ;;  %v458_v4 = vld [vmem:[#allocation5 + $0x8] sm:$0xff]   ;;  %v459_v5 = vld [vmem:[#allocation5 + $0x50] sm:$0xff]   ;;  %s580_s7 = smov [#allocation8]  }
  0x38   :  { %397 = vmatpush3.bf16.msra.mxu0 %v456_v2  ;;  %v460_v6 = vld [vmem:[#allocation5 + $0x10] sm:$0xff]   ;;  %v461_v7 = vld [vmem:[#allocation5 + $0x58] sm:$0xff]   ;;  %v463_v9 = vld [vmem:[#allocation5 + $0x60] sm:$0xff]   ;;  %443 = vmatprep.mubr.msk.bf16.mxu1 %vm579_vm0, %v578_v0  ;;  %s360_s8 = sshll.u32 %s580_s7, 4  ;;  %s361_s8 = int_to_ptr.vmem [resolvable:$true] %s360_s8 }
  0x39   :  { %398 = vmatprep.subr.bf16.mxu0 %v457_v3  ;;  %v462_v8 = vld [vmem:[#allocation5 + $0x18] sm:$0xff]   ;;  %v464_v10 = vld [vmem:[#allocation5 + $0x20] sm:$0xff]   ;;  %v465_v11 = vld [vmem:[#allocation5 + $0x68] sm:$0xff]   ;;  %p550_p11 = scmp.lt.s32.totalorder %s361_s8, %s361_s8 }
  0x3a   :  { %v62_v12 = vld [vmem:[#allocation2 + $0x8] sm:$0xff]  ;;  %v471_v14 = vld [vmem:[#allocation7] sm:$0xff]   ;;  %v466_v15 = vld [vmem:[#allocation5 + $0x28] sm:$0xff]  }
  0x3b   :  { %v64_v13 = vpack.c.bf16 %v62_v12, %v62_v12  ;;  %v467_v16 = vld [vmem:[#allocation5 + $0x70] sm:$0xff]   ;;  %428 = vmatpush3.bf16.msra.mxu1 %v471_v14  ;;  %v472_v17 = vld [vmem:[#allocation7 + $0x8] sm:$0xff]   ;;  %v469_v19 = vld [vmem:[#allocation5 + $0x78] sm:$0xff]  }
  0x3c   :  { %399 = vmatpush3.bf16.msra.mxu0 %v458_v4  ;;  %429 = vmatprep.subr.bf16.mxu1 %v578_v0  ;;  %v468_v18 = vld [vmem:[#allocation5 + $0x30] sm:$0xff]   ;;  %v470_v21 = vld [vmem:[#allocation5 + $0x38] sm:$0xff]   ;;  %v475_v25 = vld [vmem:[#allocation7 + $0x20] sm:$0xff]  }
  0x3d   :  { %400 = vmatprep.subr.bf16.mxu0 %v459_v5  ;;  %232 = vmatprep.mubr.bf16.mxu0 %v64_v13  ;;  %v473_v20 = vld [vmem:[#allocation7 + $0x10] sm:$0xff]   ;;  %v474_v23 = vld [vmem:[#allocation7 + $0x18] sm:$0xff]   ;;  %v476_v26 = vld [vmem:[#allocation7 + $0x28] sm:$0xff]  }
  0x3e   :  { %v61_v22 = vld [vmem:[#allocation2] sm:$0xff]  ;;  %v478_v28 = vld [vmem:[#allocation7 + $0x38] sm:$0xff]  }
  0x3f   :  { %430 = vmatpush3.bf16.msra.mxu1 %v472_v17  ;;  %v63_v24 = vpack.c.bf16 %v61_v22, %v61_v22  ;;  %v477_v27 = vld [vmem:[#allocation7 + $0x30] sm:$0xff]  }
  0x40   :  { %401 = vmatpush3.bf16.msra.mxu0 %v460_v6  ;;  %431 = vmatprep.subr.bf16.mxu1 %v578_v0  ;;  %v370_v30 = vld [vmem:[%s682_s2] ss:$0 sm:$0xff]  ;;  %s545_s2 = scalar_lea.vmem %s361_s8, 128 }
  0x41   :  { %402 = vmatprep.subr.bf16.mxu0 %v461_v7  ;;  %v387_v38 = vld [vmem:[%s684_s4] ss:$0 sm:$0xff]  ;;  %p546_p10 = scmp.ne.s32.totalorder %s361_s8, %s545_s2  ;;  %p551_p12 = scmp.lt.s32.totalorder %s545_s2, %s545_s2 }
  0x43   :  { %432 = vmatpush3.bf16.msra.mxu1 %v473_v20  ;;  %p552_p13 = por %p551_p12, %p550_p11 }
  0x44   :  { %403 = vmatpush3.bf16.msra.mxu0 %v462_v8  ;;  %433 = vmatprep.subr.bf16.mxu1 %v578_v0 }
  0x45   :  { %404 = vmatprep.subr.bf16.mxu0 %v463_v9  ;;  %p553_p0 = pnand %p552_p13, %p546_p10 }
  0x47   :  { %434 = vmatpush3.bf16.msra.mxu1 %v474_v23 }
  0x48   :  { %405 = vmatpush3.bf16.msra.mxu0 %v464_v10  ;;  %435 = vmatprep.subr.bf16.mxu1 %v578_v0 }
  0x49   :  { %406 = vmatprep.subr.bf16.mxu0 %v465_v11 }
  0x4b   :  { %436 = vmatpush3.bf16.msra.mxu1 %v475_v25 }
  0x4c   :  { %407 = vmatpush3.bf16.msra.mxu0 %v466_v15  ;;  %437 = vmatprep.subr.bf16.mxu1 %v578_v0 }
  0x4d   :  { %408 = vmatprep.subr.bf16.mxu0 %v467_v16 }
  0x4f   :  { %438 = vmatpush3.bf16.msra.mxu1 %v476_v26 }
  0x50   :  { %409 = vmatpush3.bf16.msra.mxu0 %v468_v18  ;;  %439 = vmatprep.subr.bf16.mxu1 %v578_v0 }
  0x51   :  { %410 = vmatprep.subr.bf16.mxu0 %v469_v19 }
  0x53   :  { %440 = vmatpush3.bf16.msra.mxu1 %v477_v27 }
  0x54   :  { %411 = vmatpush3.bf16.msra.mxu0 %v470_v21  ;;  %441 = vmatprep.subr.bf16.mxu1 %v578_v0 }
  0x57   :  { %233 = vmatmul.mubr.bf16.vlgmr.msra.gmra.mrb[0].mxu0 %v63_v24  ;;  %442 = vmatpush3.bf16.msra.mxu1 %v478_v28 }
 0x12a   :  { %v412_v29 = vpop.f32.mrb[0].mxu0 }
 0x12b   :  { %v413_v31 = vpop.f32.mrb[1].mxu0 }
 0x12c   :  { %v414_v32 = vadd.f32 %v413_v31, %v412_v29  ;;  %v415_v33 = vpop.f32.mrb[2].mxu0 }
 0x12d   :  { %v416_v34 = vpop.f32.mrb[3].mxu0 }
 0x12e   :  { %v235_v35 = vadd.f32 %v414_v32, %v370_v30 }
 0x130   :  { %v240_v36 = vmax.f32 %v235_v35, 0.0 }
 0x132   :  { %v241_v37 = vpack.c.bf16 %v240_v36, %v240_v36 }
 0x134   :  { %444 = vmatmul.mubr.bf16.vlgmr.msra.gmra.mrb[0].mxu1 %v241_v37 }
 0x207   :  { %v347_v39 = vpop.f32.mrb[0].mxu1 }
 0x208   :  { %v348_v40 = vadd.f32 %v387_v38, %v347_v39  ;;  %v445_v41 = vpop.f32.mrb[1].mxu1 }
 0x209   :  { %v350_v42 = vpop.f32.mrb[2].mxu1 }
 0x20a   :  { %353 = vst [vmem:[#allocation8] sm:$0xff] %v348_v40  ;;  %v446_v43 = vpop.f32.mrb[3].mxu1 }
 0x20b   :  { %556 = shalt.err (!%p553_p0)
}
 0x20c   :  { %s557_s4 = scalar_lea.hbm %s685_s5, 128 }
 0x20d   :  { %p558_p1 = scmp.ne.s32.totalorder %s685_s5, %s557_s4  ;;  %p561_p2 = scmp.lt.u32.totalorder %s557_s4, %s685_s5 }
 0x20f   :  { %p563_p3 = pnand %p561_p2, %p558_p1 }
 0x211   :  { %566 = shalt.err (!%p563_p3)
}
 0x212   :  { %363 = dma.vmem_to_hbm [thread:$0]  %s361_s8, 128, %s685_s5, [#allocation4]  }
 0x213   :  { %571 = dma.done.wait [#allocation4], 128  }
 0x214   :  { %572 = vsyncadd [#allocation4], 4294967168 }
 0x215   :  { %367 = vsyncpa [#allocation3], 1 }
 0x216   :  { %368 = vsyncpa [#allocation6], 1 }
 0x217   :  { %369 = vsyncpa [#allocation4], 1 }

// kernel: tpu_custom_call.1
= control target key start
LH: loop header
LB: loop body
LE: loop exit
PB: predicated region body
PF: predicated region fallthrough
CT: control target
= control target key end

     0   :  { %10 = vsyncpa [#allocation3], 0  ;;  %s680_s0 = inlined_call_operand.hbm [shape: f32[8,256], index: 0, kind: input, shape index: {}]   ;;  %s681_s1 = inlined_call_operand.hbm [shape: bf16[256,128], index: 1, kind: input, shape index: {}]   ;;  %s682_s2 = inlined_call_operand.vmem [shape: f32[1,128], index: 2, kind: input, shape index: {}]   ;;  %s683_s3 = inlined_call_operand.hbm [shape: bf16[128,128], index: 3, kind: input, shape index: {}]   ;;  %s684_s4 = inlined_call_operand.vmem [shape: f32[1,128], index: 4, kind: input, shape index: {}]   ;;  %s685_s5 = inlined_call_operand.hbm [shape: f32[8,128], index: 5, kind: output, shape index: {}]  }
   0x1   :  { %11 = vsyncpa [#allocation6], 0 }
   0x2   :  { %12 = vsyncpa [#allocation4], 0  ;;  %s573_s18 = smov [#allocation5]   ;;  %s479_s22 = scalar_lea.hbm %s681_s1, 2048 }
   0x3   :  { %s28_s19 = sshll.u32 %s573_s18, 4  ;;  %p480_p0 = scmp.ne.s32.totalorder %s681_s1, %s479_s22  ;;  %s29_s19 = int_to_ptr.vmem [resolvable:$true] %s28_s19 }
   0x4   :  { %p483_p1 = scmp.lt.u32.totalorder %s479_s22, %s681_s1 }
   0x6   :  { %p485_p2 = pnand %p483_p1, %p480_p0 }
   0x8   :  { %488 = shalt.err (!%p485_p2)
}
   0x9   :  { %s489_s27 = scalar_lea.vmem %s29_s19, 2048  ;;  %p494_p4 = scmp.lt.s32.totalorder %s29_s19, %s29_s19 }
   0xa   :  { %p490_p3 = scmp.ne.s32.totalorder %s29_s19, %s489_s27  ;;  %p495_p5 = scmp.lt.s32.totalorder %s489_s27, %s489_s27 }
   0xc   :  { %p496_p6 = por %p495_p5, %p494_p4 }
   0xe   :  { %p497_p7 = pnand %p496_p6, %p490_p3 }
  0x10   :  { %500 = shalt.err (!%p497_p7)
}
  0x11   :  { %s574_s28 = smov 64   ;;  %s575_s29 = smov 4  }
  0x12   :  { %34 = dma.hbm_to_vmem [thread:$0]  %s681_s1, 2048, %s29_s19, [#allocation6], %s574_s28, %s574_s28, %s575_s29  }
  0x13   :  { %s576_s7 = smov [#allocation2]   ;;  %s577_s9 = smov [#allocation7]  }
  0x14   :  { %s19_s8 = sshll.u32 %s576_s7, 4  ;;  %s42_s10 = sshll.u32 %s577_s9, 4  ;;  %s20_s8 = int_to_ptr.vmem [resolvable:$true] %s19_s8  ;;  %s43_s10 = int_to_ptr.vmem [resolvable:$true] %s42_s10 }
  0x15   :  { %s501_s13 = scalar_lea.hbm %s680_s0, 256 }
  0x16   :  { %p502_p8 = scmp.ne.s32.totalorder %s680_s0, %s501_s13  ;;  %p505_p9 = scmp.lt.u32.totalorder %s501_s13, %s680_s0 }
  0x18   :  { %p507_p10 = pnand %p505_p9, %p502_p8 }
  0x1a   :  { %510 = shalt.err (!%p507_p10)
}
  0x1b   :  { %s511_s1 = scalar_lea.vmem %s20_s8, 256  ;;  %p516_p12 = scmp.lt.s32.totalorder %s20_s8, %s20_s8 }
  0x1c   :  { %p512_p11 = scmp.ne.s32.totalorder %s20_s8, %s511_s1  ;;  %p517_p13 = scmp.lt.s32.totalorder %s511_s1, %s511_s1 }
  0x1e   :  { %p518_p0 = por %p517_p13, %p516_p12 }
  0x20   :  { %p519_p1 = pnand %p518_p0, %p512_p11 }
  0x22   :  { %522 = shalt.err (!%p519_p1)
}
  0x23   :  { %22 = dma.hbm_to_vmem [thread:$0]  %s680_s0, 256, %s20_s8, [#allocation3]  }
  0x24   :  { %s523_s22 = scalar_lea.hbm %s683_s3, 1024 }
  0x25   :  { %p524_p2 = scmp.ne.s32.totalorder %s683_s3, %s523_s22  ;;  %p527_p3 = scmp.lt.u32.totalorder %s523_s22, %s683_s3 }
  0x27   :  { %p529_p4 = pnand %p527_p3, %p524_p2 }
  0x29   :  { %532 = shalt.err (!%p529_p4)
}
  0x2a   :  { %s533_s27 = scalar_lea.vmem %s43_s10, 1024  ;;  %p538_p6 = scmp.lt.s32.totalorder %s43_s10, %s43_s10 }
  0x2b   :  { %p534_p5 = scmp.ne.s32.totalorder %s43_s10, %s533_s27  ;;  %p539_p7 = scmp.lt.s32.totalorder %s533_s27, %s533_s27 }
  0x2d   :  { %p540_p8 = por %p539_p7, %p538_p6 }
  0x2f   :  { %p541_p9 = pnand %p540_p8, %p534_p5 }
  0x31   :  { %544 = shalt.err (!%p541_p9)
}
  0x32   :  { %48 = dma.hbm_to_vmem [thread:$0]  %s683_s3, 1024, %s43_s10, [#allocation6], %s574_s28, %s574_s28, %s575_s29  }
  0x33   :  { %567 = dma.done.wait [#allocation3], 256  }
  0x34   :  { %568 = vsyncadd [#allocation3], 4294967040 }
  0x35   :  { %569 = dma.done.wait [#allocation6], 3072  }
  0x36   :  { %570 = vsyncadd [#allocation6], 4294964224  ;;  %v578_v0 = vmov 0.0   ;;  %v455_v1 = vld [vmem:[#allocation5 + $0x40] sm:$0xff]   ;;  %v457_v3 = vld [vmem:[#allocation5 + $0x48] sm:$0xff]   ;;  %vm579_vm0 = vmmov 0  }
  0x37   :  { %427 = vmatprep.subr.bf16.mxu1 %v578_v0  ;;  %v456_v2 = vld [vmem:[#allocation5] sm:$0xff]   ;;  %396 = vmatprep.subr.bf16.mxu0 %v455_v1  ;;  %v458_v4 = vld [vmem:[#allocation5 + $0x8] sm:$0xff]   ;;  %v459_v5 = vld [vmem:[#allocation5 + $0x50] sm:$0xff]   ;;  %s580_s7 = smov [#allocation8]  }
  0x38   :  { %397 = vmatpush3.bf16.msra.mxu0 %v456_v2  ;;  %v460_v6 = vld [vmem:[#allocation5 + $0x10] sm:$0xff]   ;;  %v461_v7 = vld [vmem:[#allocation5 + $0x58] sm:$0xff]   ;;  %v463_v9 = vld [vmem:[#allocation5 + $0x60] sm:$0xff]   ;;  %443 = vmatprep.mubr.msk.bf16.mxu1 %vm579_vm0, %v578_v0  ;;  %s360_s8 = sshll.u32 %s580_s7, 4  ;;  %s361_s8 = int_to_ptr.vmem [resolvable:$true] %s360_s8 }
  0x39   :  { %398 = vmatprep.subr.bf16.mxu0 %v457_v3  ;;  %v462_v8 = vld [vmem:[#allocation5 + $0x18] sm:$0xff]   ;;  %v464_v10 = vld [vmem:[#allocation5 + $0x20] sm:$0xff]   ;;  %v465_v11 = vld [vmem:[#allocation5 + $0x68] sm:$0xff]   ;;  %p550_p11 = scmp.lt.s32.totalorder %s361_s8, %s361_s8 }
  0x3a   :  { %v62_v12 = vld [vmem:[#allocation2 + $0x8] sm:$0xff]  ;;  %v471_v14 = vld [vmem:[#allocation7] sm:$0xff]   ;;  %v466_v15 = vld [vmem:[#allocation5 + $0x28] sm:$0xff]  }
  0x3b   :  { %v64_v13 = vpack.c.bf16 %v62_v12, %v62_v12  ;;  %v467_v16 = vld [vmem:[#allocation5 + $0x70] sm:$0xff]   ;;  %428 = vmatpush3.bf16.msra.mxu1 %v471_v14  ;;  %v472_v17 = vld [vmem:[#allocation7 + $0x8] sm:$0xff]   ;;  %v469_v19 = vld [vmem:[#allocation5 + $0x78] sm:$0xff]  }
  0x3c   :  { %399 = vmatpush3.bf16.msra.mxu0 %v458_v4  ;;  %429 = vmatprep.subr.bf16.mxu1 %v578_v0  ;;  %v468_v18 = vld [vmem:[#allocation5 + $0x30] sm:$0xff]   ;;  %v470_v21 = vld [vmem:[#allocation5 + $0x38] sm:$0xff]   ;;  %v475_v25 = vld [vmem:[#allocation7 + $0x20] sm:$0xff]  }
  0x3d   :  { %400 = vmatprep.subr.bf16.mxu0 %v459_v5  ;;  %232 = vmatprep.mubr.bf16.mxu0 %v64_v13  ;;  %v473_v20 = vld [vmem:[#allocation7 + $0x10] sm:$0xff]   ;;  %v474_v23 = vld [vmem:[#allocation7 + $0x18] sm:$0xff]   ;;  %v476_v26 = vld [vmem:[#allocation7 + $0x28] sm:$0xff]  }
  0x3e   :  { %v61_v22 = vld [vmem:[#allocation2] sm:$0xff]  ;;  %v478_v28 = vld [vmem:[#allocation7 + $0x38] sm:$0xff]  }
  0x3f   :  { %430 = vmatpush3.bf16.msra.mxu1 %v472_v17  ;;  %v63_v24 = vpack.c.bf16 %v61_v22, %v61_v22  ;;  %v477_v27 = vld [vmem:[#allocation7 + $0x30] sm:$0xff]  }
  0x40   :  { %401 = vmatpush3.bf16.msra.mxu0 %v460_v6  ;;  %431 = vmatprep.subr.bf16.mxu1 %v578_v0  ;;  %v370_v30 = vld [vmem:[%s682_s2] ss:$0 sm:$0xff]  ;;  %s545_s2 = scalar_lea.vmem %s361_s8, 128 }
  0x41   :  { %402 = vmatprep.subr.bf16.mxu0 %v461_v7  ;;  %v387_v38 = vld [vmem:[%s684_s4] ss:$0 sm:$0xff]  ;;  %p546_p10 = scmp.ne.s32.totalorder %s361_s8, %s545_s2  ;;  %p551_p12 = scmp.lt.s32.totalorder %s545_s2, %s545_s2 }
  0x43   :  { %432 = vmatpush3.bf16.msra.mxu1 %v473_v20  ;;  %p552_p13 = por %p551_p12, %p550_p11 }
  0x44   :  { %403 = vmatpush3.bf16.msra.mxu0 %v462_v8  ;;  %433 = vmatprep.subr.bf16.mxu1 %v578_v0 }
  0x45   :  { %404 = vmatprep.subr.bf16.mxu0 %v463_v9  ;;  %p553_p0 = pnand %p552_p13, %p546_p10 }
  0x47   :  { %434 = vmatpush3.bf16.msra.mxu1 %v474_v23 }
  0x48   :  { %405 = vmatpush3.bf16.msra.mxu0 %v464_v10  ;;  %435 = vmatprep.subr.bf16.mxu1 %v578_v0 }
  0x49   :  { %406 = vmatprep.subr.bf16.mxu0 %v465_v11 }
  0x4b   :  { %436 = vmatpush3.bf16.msra.mxu1 %v475_v25 }
  0x4c   :  { %407 = vmatpush3.bf16.msra.mxu0 %v466_v15  ;;  %437 = vmatprep.subr.bf16.mxu1 %v578_v0 }
  0x4d   :  { %408 = vmatprep.subr.bf16.mxu0 %v467_v16 }
  0x4f   :  { %438 = vmatpush3.bf16.msra.mxu1 %v476_v26 }
  0x50   :  { %409 = vmatpush3.bf16.msra.mxu0 %v468_v18  ;;  %439 = vmatprep.subr.bf16.mxu1 %v578_v0 }
  0x51   :  { %410 = vmatprep.subr.bf16.mxu0 %v469_v19 }
  0x53   :  { %440 = vmatpush3.bf16.msra.mxu1 %v477_v27 }
  0x54   :  { %411 = vmatpush3.bf16.msra.mxu0 %v470_v21  ;;  %441 = vmatprep.subr.bf16.mxu1 %v578_v0 }
  0x57   :  { %233 = vmatmul.mubr.bf16.vlgmr.msra.gmra.mrb[0].mxu0 %v63_v24  ;;  %442 = vmatpush3.bf16.msra.mxu1 %v478_v28 }
 0x12a   :  { %v412_v29 = vpop.f32.mrb[0].mxu0 }
 0x12b   :  { %v413_v31 = vpop.f32.mrb[1].mxu0 }
 0x12c   :  { %v414_v32 = vadd.f32 %v413_v31, %v412_v29  ;;  %v415_v33 = vpop.f32.mrb[2].mxu0 }
 0x12d   :  { %v416_v34 = vpop.f32.mrb[3].mxu0 }
 0x12e   :  { %v235_v35 = vadd.f32 %v414_v32, %v370_v30 }
 0x130   :  { %v240_v36 = vmax.f32 %v235_v35, 0.0 }
 0x132   :  { %v241_v37 = vpack.c.bf16 %v240_v36, %v240_v36 }
 0x134   :  { %444 = vmatmul.mubr.bf16.vlgmr.msra.gmra.mrb[0].mxu1 %v241_v37 }
 0x207   :  { %v347_v39 = vpop.f32.mrb[0].mxu1 }
 0x208   :  { %v348_v40 = vadd.f32 %v387_v38, %v347_v39  ;;  %v445_v41 = vpop.f32.mrb[1].mxu1 }
 0x209   :  { %v350_v42 = vpop.f32.mrb[2].mxu1 }
 0x20a   :  { %353 = vst [vmem:[#allocation8] sm:$0xff] %v348_v40  ;;  %v446_v43 = vpop.f32.mrb[3].mxu1 }
 0x20b   :  { %556 = shalt.err (!%p553_p0)
}
 0x20c   :  { %s557_s4 = scalar_lea.hbm %s685_s5, 128 }
 0x20d   :  { %p558_p1 = scmp.ne.s32.totalorder %s685_s5, %s557_s4  ;;  %p561_p2 = scmp.lt.u32.totalorder %s557_s4, %s685_s5 }
 0x20f   :  { %p563_p3 = pnand %p561_p2, %p558_p1 }
 0x211   :  { %566 = shalt.err (!%p563_p3)
}
 0x212   :  { %363 = dma.vmem_to_hbm [thread:$0]  %s361_s8, 128, %s685_s5, [#allocation4]  }
 0x213   :  { %571 = dma.done.wait [#allocation4], 128  }
 0x214   :  { %572 = vsyncadd [#allocation4], 4294967168 }
 0x215   :  { %367 = vsyncpa [#allocation3], 1 }
 0x216   :  { %368 = vsyncpa [#allocation6], 1 }
 0x217   :  { %369 = vsyncpa [#allocation4], 1 }

</bundles_post_ra>
